<compile_context>
chip_gen: v6e
topology: v6e:2x2x1
jax: 0.10.0
libtpu: 0.0.40
codegen_flags: <defaults>
</compile_context>

<pallas_src>
import jax
import jax.numpy as jnp
from jax import lax
from jax.experimental import pallas as pl
from jax.experimental.pallas import tpu as pltpu

BN_EPS = 1e-5


# -----------------------------------------------------------------------------
# Kernel: one batch tile of BM rows; all folded weights VMEM-resident.
# -----------------------------------------------------------------------------
def mlp_kernel(x_ref,
               w01_ref, b01_ref,   # (Linear0 + BN0 + Linear1) folded, bf16 / f32
               w2_ref, b2_ref,     # Linear2 with BN1 folded into its input side
               w3_ref, b3_ref,     # head row [1, h1] with BN2 folded in, bias [1,1]
               o_ref):
    # Cast x to bf16 in-kernel (VPU is idle) -> both matmuls take the bf16 MXU path.
    x = x_ref[...].astype(jnp.bfloat16)                                    # [BM, D]

    # fused (Linear0 + BN0 + Linear1) -> ReLU
    h = jnp.dot(x, w01_ref[...], preferred_element_type=jnp.float32) + b01_ref[...]
    h = jnp.maximum(h, 0.0).astype(jnp.bfloat16)                           # [BM, h0]

    # Linear2 (+ folded BN1 on its input) -> ReLU
    h = jnp.dot(h, w2_ref[...], preferred_element_type=jnp.float32) + b2_ref[...]
    h = jnp.maximum(h, 0.0)                                                # [BM, h1] f32

    # Head (+ folded BN2): contract last dims -> lane-dense [1, BM] logits row.
    logits = lax.dot_general(w3_ref[...], h, (((1,), (1,)), ((), ())),
                             preferred_element_type=jnp.float32) + b3_ref[...]
    o_ref[...] = jax.nn.sigmoid(logits)                                    # [1, BM]


# -----------------------------------------------------------------------------
# One-time trace-time folding (BN affines + Linear0 into Linear1), bf16 weights.
# -----------------------------------------------------------------------------
def fold_params(params):
    (w0, b0, g0, be0, rm0, rv0,
     w1, b1, g1, be1, rm1, rv1,
     w2, b2, g2, be2, rm2, rv2,
     w3, b3) = params

    # BN0 directly after Linear0 (no activation): fold into W0/b0, then into W1/b1.
    s0 = g0 * jax.lax.rsqrt(rv0 + BN_EPS)           # [1, d0]
    w0f = w0 * s0
    b0f = (b0 - rm0) * s0 + be0
    w01 = w0f @ w1                                  # [D, h0]
    b01 = b0f @ w1 + b1                             # [1, h0]

    # BN1 after ReLU of layer 1: per-feature affine on layer-2's input.
    s1 = g1 * jax.lax.rsqrt(rv1 + BN_EPS)           # [1, h0]
    t1 = be1 - rm1 * s1
    w2f = w2 * s1.T                                 # scale input rows
    b2f = b2 + t1 @ w2

    # BN2 after ReLU of layer 2: fold into the head.
    s2 = g2 * jax.lax.rsqrt(rv2 + BN_EPS)           # [1, h1]
    t2 = be2 - rm2 * s2
    w3f = w3 * s2.T                                 # [h1, 1]
    b3f = b3 + t2 @ w3                              # [1, 1]
    w3_row = w3f.T                                  # [1, h1]

    return (w01.astype(jnp.bfloat16), b01.astype(jnp.float32),
            w2f.astype(jnp.bfloat16), b2f.astype(jnp.float32),
            w3_row.astype(jnp.float32), b3f.astype(jnp.float32))


def _round_up(a, m):
    return ((a + m - 1) // m) * m


# -----------------------------------------------------------------------------
# Wrapper: 1-D batch grid, resident weights, lane-dense output, no input pad.
# -----------------------------------------------------------------------------
@jax.jit
def mlp_forward(x, folded):
    w01, b01, w2f, b2f, w3r, b3f = folded
    B, D = x.shape
    h0 = w01.shape[1]
    h1 = w2f.shape[1]

    # Batch tile: single tile for small/medium batches; at large batch keep >= 4
    # grid steps (megacore sharding on v7x) and cap at 2048 rows (x tile f32 is
    # only 256 KiB at D=32 -> nowhere near any VMEM limit).
    if B >= 1024:
        BM = min(2048, max(256, _round_up(pl.cdiv(B, 4), 8)))
    else:
        BM = B
    grid = pl.cdiv(B, BM)

    const = lambda i: (0, 0)   # weights stay VMEM-resident across grid steps

    out = pl.pallas_call(
        mlp_kernel,
        out_shape=jax.ShapeDtypeStruct((grid, BM), jnp.float32),
        grid=(grid,),
        in_specs=[
            pl.BlockSpec((BM, D), lambda i: (i, 0)),        # x tiled over batch
            pl.BlockSpec((D, h0), const), pl.BlockSpec((1, h0), const),
            pl.BlockSpec((h0, h1), const), pl.BlockSpec((1, h1), const),
            pl.BlockSpec((1, h1), const), pl.BlockSpec((1, 1), const),
        ],
        out_specs=pl.BlockSpec((1, BM), lambda i: (i, 0)),  # lane-dense output row
        compiler_params=pltpu.CompilerParams(dimension_semantics=("parallel",)),
    )(x, w01, b01, w2f, b2f, w3r, b3f)

    # (grid, BM) row-major == global row order; drop ragged-tile garbage rows.
    return out.reshape(-1)[:B].reshape(B, 1)


# -----------------------------------------------------------------------------
# Deterministic synthetic parameters (PyTorch shapes, weights stored transposed).
# -----------------------------------------------------------------------------
def make_params(key, input_dim, hidden_layers):
    dims = [input_dim, input_dim] + list(hidden_layers) + [1]
    keys = jax.random.split(key, 64)
    ki = iter(range(64))

    def linear(din, dout):
        w = jax.random.normal(keys[next(ki)], (din, dout), jnp.float32) * (1.0 / jnp.sqrt(din))
        b = jax.random.normal(keys[next(ki)], (1, dout), jnp.float32) * 0.1
        return w, b

    def bn(d):
        gamma = 1.0 + 0.1 * jax.random.normal(keys[next(ki)], (1, d), jnp.float32)
        beta = 0.1 * jax.random.normal(keys[next(ki)], (1, d), jnp.float32)
        rmean = 0.1 * jax.random.normal(keys[next(ki)], (1, d), jnp.float32)
        rvar = 0.5 + jax.random.uniform(keys[next(ki)], (1, d), jnp.float32)
        return gamma, beta, rmean, rvar

    params = []
    w0, b0 = linear(dims[0], dims[1]); params += [w0, b0, *bn(dims[1])]
    w1, b1 = linear(dims[1], dims[2]); params += [w1, b1, *bn(dims[2])]
    w2, b2 = linear(dims[2], dims[3]); params += [w2, b2, *bn(dims[3])]
    w3, b3 = linear(dims[3], dims[4]); params += [w3, b3]
    return params


def _bn_eval(h, gamma, beta, rmean, rvar):
    return (h - rmean) * jax.lax.rsqrt(rvar + BN_EPS) * gamma + beta


def reference_forward(x, params):
    (w0, b0, g0, be0, rm0, rv0,
     w1, b1, g1, be1, rm1, rv1,
     w2, b2, g2, be2, rm2, rv2,
     w3, b3) = params
    h = x @ w0 + b0
    h = _bn_eval(h, g0, be0, rm0, rv0)
    h = jnp.maximum(h @ w1 + b1, 0.0)
    h = _bn_eval(h, g1, be1, rm1, rv1)
    h = jnp.maximum(h @ w2 + b2, 0.0)
    h = _bn_eval(h, g2, be2, rm2, rv2)
    return jax.nn.sigmoid(h @ w3 + b3)


if __name__ == "__main__":
    # Model(input_dim=32, hidden_layers=[64, 32], activation_func="ReLU", dropout=0.1)
    # TODO(synk): training-mode Dropout / batch-statistics BN not implemented (eval-mode forward).
    input_dim = 32
    hidden_layers = (64, 32)
    batch = 8

    key = jax.random.PRNGKey(0)
    kx, kp = jax.random.split(key)
    x = jax.random.normal(kx, (batch, input_dim), jnp.float32)
    params = make_params(kp, input_dim, hidden_layers)

    folded = fold_params(params)          # fold once, outside the per-call jit path

    out = mlp_forward(x, folded)
    out = jax.block_until_ready(out)

    ref = reference_forward(x, params)    # exact f32 reference
    assert out.shape == (batch, 1)
    # bf16 matmul path -> loosened tolerance vs the f32 reference.
    assert jnp.allclose(out, ref, atol=2e-2, rtol=2e-2), float(jnp.max(jnp.abs(out - ref)))
    print("KERNEL_OK")
</pallas_src>

<mosaic_0001>
module attributes {stable_mosaic.version = 11 : i64} {
  func.func @mlp_kernel(%arg0: i32, %arg1: memref<8x32xf32, #tpu.memory_space<vmem>>, %arg2: memref<32x64xbf16, #tpu.memory_space<vmem>>, %arg3: memref<1x64xf32, #tpu.memory_space<vmem>>, %arg4: memref<64x32xbf16, #tpu.memory_space<vmem>>, %arg5: memref<1x32xf32, #tpu.memory_space<vmem>>, %arg6: memref<1x32xf32, #tpu.memory_space<vmem>>, %arg7: memref<1x1xf32, #tpu.memory_space<vmem>>, %arg8: memref<1x8xf32, #tpu.memory_space<vmem>>) attributes {dimension_semantics = [#tpu.dimension_semantics<parallel>], iteration_bounds = array<i64: 1>, scalar_prefetch = 0 : i64, scratch_operands = 0 : i64, tpu.core_type = #tpu.core_type<tc>, window_params = [{transform_indices = @transform_0, window_bounds = array<i64: 8, 32>}, {pipeline_mode = #tpu.pipeline_mode<synchronous>, transform_indices = @transform_1, window_bounds = array<i64: 32, 64>}, {pipeline_mode = #tpu.pipeline_mode<synchronous>, transform_indices = @transform_2, window_bounds = array<i64: 1, 64>}, {pipeline_mode = #tpu.pipeline_mode<synchronous>, transform_indices = @transform_3, window_bounds = array<i64: 64, 32>}, {pipeline_mode = #tpu.pipeline_mode<synchronous>, transform_indices = @transform_4, window_bounds = array<i64: 1, 32>}, {pipeline_mode = #tpu.pipeline_mode<synchronous>, transform_indices = @transform_5, window_bounds = array<i64: 1, 32>}, {pipeline_mode = #tpu.pipeline_mode<synchronous>, transform_indices = @transform_6, window_bounds = array<i64: 1, 1>}, {transform_indices = @transform_7, window_bounds = array<i64: 1, 8>}]} {
    %c0 = arith.constant 0 : index
    %c0_0 = arith.constant 0 : index
    %0 = vector.load %arg1[%c0, %c0_0] : memref<8x32xf32, #tpu.memory_space<vmem>>, vector<8x32xf32>
    %1 = arith.truncf %0 : vector<8x32xf32> to vector<8x32xbf16>
    %c0_1 = arith.constant 0 : index
    %c0_2 = arith.constant 0 : index
    %2 = vector.load %arg2[%c0_1, %c0_2] : memref<32x64xbf16, #tpu.memory_space<vmem>>, vector<32x64xbf16>
    %cst = arith.constant dense<0.000000e+00> : vector<8x64xf32>
    %3 = tpu.matmul %1, %2, %cst {dimension_numbers = #tpu.dot_dimension_numbers<[1], [0], [0], [1], [0, 0, 1, 1], [], []>} : vector<8x32xbf16>, vector<32x64xbf16>, vector<8x64xf32> -> vector<8x64xf32>
    %c0_3 = arith.constant 0 : index
    %c0_4 = arith.constant 0 : index
    %4 = vector.load %arg3[%c0_3, %c0_4] : memref<1x64xf32, #tpu.memory_space<vmem>>, vector<1x64xf32>
    %5 = vector.broadcast %4 : vector<1x64xf32> to vector<8x64xf32>
    %6 = arith.addf %3, %5 : vector<8x64xf32>
    %cst_5 = arith.constant 0.000000e+00 : f32
    %7 = vector.broadcast %cst_5 : f32 to vector<8x64xf32>
    %8 = arith.maximumf %6, %7 : vector<8x64xf32>
    %9 = arith.truncf %8 : vector<8x64xf32> to vector<8x64xbf16>
    %c0_6 = arith.constant 0 : index
    %c0_7 = arith.constant 0 : index
    %10 = vector.load %arg4[%c0_6, %c0_7] : memref<64x32xbf16, #tpu.memory_space<vmem>>, vector<64x32xbf16>
    %cst_8 = arith.constant dense<0.000000e+00> : vector<8x32xf32>
    %11 = tpu.matmul %9, %10, %cst_8 {dimension_numbers = #tpu.dot_dimension_numbers<[1], [0], [0], [1], [0, 0, 1, 1], [], []>} : vector<8x64xbf16>, vector<64x32xbf16>, vector<8x32xf32> -> vector<8x32xf32>
    %c0_9 = arith.constant 0 : index
    %c0_10 = arith.constant 0 : index
    %12 = vector.load %arg5[%c0_9, %c0_10] : memref<1x32xf32, #tpu.memory_space<vmem>>, vector<1x32xf32>
    %13 = vector.broadcast %12 : vector<1x32xf32> to vector<8x32xf32>
    %14 = arith.addf %11, %13 : vector<8x32xf32>
    %cst_11 = arith.constant 0.000000e+00 : f32
    %15 = vector.broadcast %cst_11 : f32 to vector<8x32xf32>
    %16 = arith.maximumf %14, %15 : vector<8x32xf32>
    %c0_12 = arith.constant 0 : index
    %c0_13 = arith.constant 0 : index
    %17 = vector.load %arg6[%c0_12, %c0_13] : memref<1x32xf32, #tpu.memory_space<vmem>>, vector<1x32xf32>
    %cst_14 = arith.constant dense<0.000000e+00> : vector<1x8xf32>
    %18 = tpu.matmul %17, %16, %cst_14 {dimension_numbers = #tpu.dot_dimension_numbers<[1], [1], [0], [0], [0, 0, 1, 0], [], []>} : vector<1x32xf32>, vector<8x32xf32>, vector<1x8xf32> -> vector<1x8xf32>
    %c0_15 = arith.constant 0 : index
    %c0_16 = arith.constant 0 : index
    %19 = vector.load %arg7[%c0_15, %c0_16] : memref<1x1xf32, #tpu.memory_space<vmem>>, vector<1x1xf32>
    %20 = vector.broadcast %19 : vector<1x1xf32> to vector<1x8xf32>
    %21 = arith.addf %18, %20 : vector<1x8xf32>
    %22 = arith.negf %21 : vector<1x8xf32>
    %23 = math.exp %22 : vector<1x8xf32>
    %cst_17 = arith.constant 1.000000e+00 : f32
    %24 = vector.broadcast %cst_17 : f32 to vector<1x8xf32>
    %25 = arith.addf %24, %23 : vector<1x8xf32>
    %26 = arith.divf %24, %25 : vector<1x8xf32>
    %c0_18 = arith.constant 0 : index
    %c0_19 = arith.constant 0 : index
    %27 = vector.load %arg8[%c0_18, %c0_19] : memref<1x8xf32, #tpu.memory_space<vmem>>, vector<1x8xf32>
    tpu.vector_store %arg8[%c0_18, %c0_19], %26 {strides = array<i32>} : memref<1x8xf32, #tpu.memory_space<vmem>>, vector<1x8xf32>,
    return
  }
  func.func @transform_0(%arg0: i32) -> (i32, i32) {
    %c0_i32 = arith.constant 0 : i32
    %c0_i32_0 = arith.constant 0 : i32
    return %arg0, %c0_i32 : i32, i32
  }
  func.func @transform_1(%arg0: i32) -> (i32, i32) {
    %c0_i32 = arith.constant 0 : i32
    %c0_i32_0 = arith.constant 0 : i32
    %c0_i32_1 = arith.constant 0 : i32
    return %c0_i32, %c0_i32_0 : i32, i32
  }
  func.func @transform_2(%arg0: i32) -> (i32, i32) {
    %c0_i32 = arith.constant 0 : i32
    %c0_i32_0 = arith.constant 0 : i32
    %c0_i32_1 = arith.constant 0 : i32
    return %c0_i32, %c0_i32_0 : i32, i32
  }
  func.func @transform_3(%arg0: i32) -> (i32, i32) {
    %c0_i32 = arith.constant 0 : i32
    %c0_i32_0 = arith.constant 0 : i32
    %c0_i32_1 = arith.constant 0 : i32
    return %c0_i32, %c0_i32_0 : i32, i32
  }
  func.func @transform_4(%arg0: i32) -> (i32, i32) {
    %c0_i32 = arith.constant 0 : i32
    %c0_i32_0 = arith.constant 0 : i32
    %c0_i32_1 = arith.constant 0 : i32
    return %c0_i32, %c0_i32_0 : i32, i32
  }
  func.func @transform_5(%arg0: i32) -> (i32, i32) {
    %c0_i32 = arith.constant 0 : i32
    %c0_i32_0 = arith.constant 0 : i32
    %c0_i32_1 = arith.constant 0 : i32
    return %c0_i32, %c0_i32_0 : i32, i32
  }
  func.func @transform_6(%arg0: i32) -> (i32, i32) {
    %c0_i32 = arith.constant 0 : i32
    %c0_i32_0 = arith.constant 0 : i32
    %c0_i32_1 = arith.constant 0 : i32
    return %c0_i32, %c0_i32_0 : i32, i32
  }
  func.func @transform_7(%arg0: i32) -> (i32, i32) {
    %c0_i32 = arith.constant 0 : i32
    %c0_i32_0 = arith.constant 0 : i32
    return %arg0, %c0_i32 : i32, i32
  }
}

</mosaic_0001>

<bundles_post_ra>
// kernel: mlp_forward.1
= control target key start
LH: loop header
LB: loop body
LE: loop exit
PB: predicated region body
PF: predicated region fallthrough
CT: control target
= control target key end

     0   :  { %s465_s0 = inlined_call_operand.vmem [shape: f32[8,32], index: 0, kind: input, shape index: {}]   ;;  %s466_s1 = inlined_call_operand.vmem [shape: bf16[32,64], index: 1, kind: input, shape index: {}]   ;;  %s467_s2 = inlined_call_operand.vmem [shape: f32[1,64], index: 2, kind: input, shape index: {}]   ;;  %s468_s3 = inlined_call_operand.vmem [shape: bf16[64,32], index: 3, kind: input, shape index: {}]   ;;  %s469_s4 = inlined_call_operand.vmem [shape: f32[1,32], index: 4, kind: input, shape index: {}]   ;;  %s470_s5 = inlined_call_operand.vmem [shape: f32[1,32], index: 5, kind: input, shape index: {}]   ;;  %s471_s6 = inlined_call_operand.<no memory space> [shape: f32[1,1], index: 6, kind: input, shape index: {}]   ;;  %s472_s7 = inlined_call_operand.hbm [shape: f32[1,8], index: 7, kind: output, shape index: {}]  }
   0x1   :  { %v12_v0 = vstv %s471_s6 }
   0x2   :  { %13 = vst [vmem:[#allocation2] sm:$0x1] %v12_v0 }
   0x3   :  { %v347_v1 = vld [vmem:[%s466_s1 + $0x8] sm:$0xff]   ;;  %v379_v2 = vmov 0.0   ;;  %v348_v3 = vld [vmem:[%s466_s1] sm:$0xff]   ;;  %vm380_vm0 = vmmov 0   ;;  %v349_v5 = vld [vmem:[%s468_s3 + $0x18] sm:$0xff]   ;;  %vm55_vm1 = vcmask 261120  }
   0x4   :  { %317 = vmatprep.subr.bf16.mxu0 %v379_v2  ;;  %325 = vmatprep.subr.bf16.mxu1 %v379_v2  ;;  %v30_v4 = vld [vmem:[%s465_s0] sm:$0xff]  ;;  %v350_v6 = vld [vmem:[%s468_s3 + $0x10] sm:$0xff]  }
   0x5   :  { %318 = vmatpush3.bf16.msra.mxu0 %v347_v1  ;;  %321 = vmatprep.mubr.msk.bf16.mxu0 %vm380_vm0, %v379_v2  ;;  %v31_v7 = vpack.c.bf16 %v30_v4, %v30_v4 }
   0x6   :  { %319 = vmatprep.subr.bf16.mxu0 %v379_v2  ;;  %333 = vmatprep.mubr.msk.bf16.mxu1 %vm380_vm0, %v379_v2 }
   0x7   :  { %326 = vmatpush3.bf16.msra.mxu1 %v349_v5 }
   0x8   :  { %327 = vmatprep.subr.bf16.mxu1 %v379_v2 }
   0x9   :  { %320 = vmatpush3.bf16.msra.mxu0 %v348_v3 }
   0xa   :  { %14 = vsyncpa [#allocation4], 0  ;;  %337 = vmatprep.subr.mxu0 %v379_v2  ;;  %v351_v8 = vld [vmem:[%s468_s3 + $0x8] sm:$0xff]   ;;  %v352_v9 = vld [vmem:[%s468_s3] sm:$0xff]   ;;  %vm140_vm2 = vcmask 523264   ;;  %v381_v19 = vmov 0   ;;  %v192_v28 = vlaneseq }
   0xb   :  { %328 = vmatpush3.bf16.msra.mxu1 %v350_v6  ;;  %v294_v10 = vld [vmem:[%s467_s2] ss:$0 sm:$0xff]  ;;  %346 = vset.pattern.permute.xlu0 %v381_v19  ;;  %vm278_vm3 = vcmask 57344  }
   0xc   :  { %322 = vmatmul.mubr.msk.bf16.vlgmr.msra.gmra.mxu0 %vm55_vm1, %v31_v7  ;;  %329 = vmatprep.subr.bf16.mxu1 %v379_v2  ;;  %v186_v18 = vld [vmem:[#allocation2] sm:$0x1]  ;;  %v193_v29 = vshrl.u32 %v192_v28, 7 }
   0xd   :  { %339 = vmatprep.mubr.msk.f32.mxu0 %vm380_vm0, %v379_v2  ;;  %189 = vperm.xlu0 %346, %v186_v18   ;;  %v298_v20 = vld [vmem:[%s469_s4] ss:$0 sm:$0xff]  ;;  %s382_s4 = smov [#allocation3]  }
   0xe   :  { %v185_v26 = vld [vmem:[%s470_s5] sm:$0x1]  ;;  %v194_v30 = vsub.s32 0, %v193_v29  ;;  %s286_s18 = sshll.u32 %s382_s4, 4  ;;  %s287_s18 = int_to_ptr.vmem [resolvable:$true] %s286_s18 }
   0xf   :  { %330 = vmatpush3.bf16.msra.mxu1 %v351_v8  ;;  %s357_s5 = scalar_lea.vmem %s287_s18, 16  ;;  %s361_s19 = scalar_lea.vmem %s287_s18, 32 }
  0x10   :  { %331 = vmatprep.subr.bf16.mxu1 %v379_v2  ;;  %p358_p0 = scmp.ne.s32.totalorder %s287_s18, %s357_s5  ;;  %p362_p1 = scmp.lt.s32.totalorder %s287_s18, %s287_s18 }
  0x11   :  { %p363_p2 = scmp.lt.s32.totalorder %s361_s19, %s357_s5 }
  0x13   :  { %332 = vmatpush3.bf16.msra.mxu1 %v352_v9  ;;  %p364_p3 = por %p363_p2, %p362_p1 }
  0x15   :  { %p365_p4 = pnand %p364_p3, %p358_p0 }
  0x88   :  { %v190_v31 = vpop.permute.xlu0 %189 }
  0x89   :  { %v195_v32 = vrot.slane %v190_v31, %v194_v30 }
  0xcc   :  { %v93_v11 = vpop.f32.mrf.mxu0 }
  0xcd   :  { %v94_v12 = vadd.f32 %v294_v10, %v93_v11 }
  0xce   :  { %v323_v13 = vpop.f32.mrf.mxu0 }
  0xcf   :  { %v99_v14 = vmax.f32 %v94_v12, 0.0 }
  0xd0   :  { %v96_v15 = vpop.f32.mrf.mxu0 }
  0xd1   :  { %v100_v16 = vpack.c.bf16 %v99_v14, %v99_v14 }
  0xd2   :  { %v324_v17 = vpop.f32.mrf.mxu0 }
  0xd3   :  { %334 = vmatmul.mubr.msk.bf16.vlgmr.msra.gmra.mxu1 %vm140_vm2, %v100_v16 }
 0x193   :  { %v178_v21 = vpop.f32.mrf.mxu1 }
 0x194   :  { %v179_v22 = vadd.f32 %v298_v20, %v178_v21 }
 0x195   :  { %v335_v23 = vpop.f32.mrf.mxu1 }
 0x196   :  { %v184_v24 = vmax.f32 %v179_v22, 0.0 }
 0x197   :  { %v181_v25 = vpop.f32.mrf.mxu1 }
 0x198   :  { %338 = vmatpush3.xpose.msk.msra.mxu0 %vm55_vm1, %v184_v24 }
 0x199   :  { %v336_v27 = vpop.f32.mrf.mxu1 }
 0x19b   :  { %340 = vmatmul.mubr.msk.f32.vlgmr.msra.gmra.mxu0 %vm55_vm1, %v185_v26 }
 0x25b   :  { %v268_v33 = vpop.f32.mrf.mxu0 }
 0x25c   :  { %v269_v34 = vadd.f32 %v268_v33, %v195_v32 }
 0x25d   :  { %v341_v35 = vpop.f32.mrf.mxu0 }
 0x25e   :  { %v306_v36 = vmul.f32 -1.442695, %v269_v34 }
 0x260   :  { %353 = vpow2.f32 %v306_v36 }
 0x26d   :  { %v354_v37 = vpop.eup %353 }
 0x26e   :  { %v275_v38 = vadd.f32 1.0, %v354_v37 }
 0x270   :  { %355 = vrcp.f32 %v275_v38 }
 0x27d   :  { %v356_v39 = vpop.eup %355 }
 0x27e   :  { %279 = vst.msk [vmem:[#allocation3] sm:$0x1] %vm278_vm3, %v356_v39 }
 0x27f   :  { %368 = shalt.err (!%p365_p4)
}
 0x280   :  { %289 = dma.vmem_to_hbm [thread:$0]  %s287_s18, 16, %s472_s7, [#allocation4]  }
 0x281   :  { %377 = dma.done.wait [#allocation4], 16  }
 0x282   :  { %378 = vsyncadd [#allocation4], 4294967280 }
 0x283   :  { %293 = vsyncpa [#allocation4], 1 }

</bundles_post_ra>
